<compile_context>
chip_gen: v7x
topology: tpu7x:2x2x1
jax: 0.10.0
libtpu: 0.0.40
codegen_flags: <defaults>
</compile_context>

<pallas_src>
import jax
import jax.numpy as jnp
from jax.experimental import pallas as pl
from jax.experimental.pallas import tpu as pltpu


# ----------------------------------------------------------------------------
# Kernel body: two MXU matmuls + VPU ReLUs on the current row tile.
# ----------------------------------------------------------------------------
def adapter_kernel(x_ref, w1t_ref, w2t_ref, o_ref):
    x = x_ref[...]
    h = jnp.dot(x, w1t_ref[...], preferred_element_type=jnp.float32)
    h = jnp.maximum(h, 0.0)
    # Cast the intermediate to the streaming dtype for the second MXU pass
    # (no-op for the f32 path); accumulate in f32.
    y = jnp.dot(h.astype(w2t_ref.dtype), w2t_ref[...],
                preferred_element_type=jnp.float32)
    y = jnp.maximum(y, 0.0)
    o_ref[...] = y.astype(o_ref.dtype)


# ----------------------------------------------------------------------------
# Tiling heuristics.
# ----------------------------------------------------------------------------
_MIN_PARALLEL_TM = 1024            # never shrink below this for "parallelism"
_VMEM_BUDGET = 16 * 1024 * 1024    # conservative estimate ceiling for tiles
_VMEM_LIMIT = 32 * 1024 * 1024     # scoped VMEM request (ok on v5e/v6e/v7x)


def _round_up(x, m):
    return ((x + m - 1) // m) * m


def _choose_tm(n, c_in, hidden_p, in_bytes, out_bytes, max_tm):
    """Pick the row-tile height.

    - Start big (amortizes the ~0.35 us per-grid-step overhead).
    - Cap by an estimated VMEM footprint (double-buffered x / out tiles plus
      f32 intermediates), staying well under the 32 MiB scoped limit.
    - Shrink only to guarantee >=2 grid steps for large inputs (so both v7x
      TensorCores get work), but never below _MIN_PARALLEL_TM: on 1-TC
      v5e/v6e smaller tiles only add per-step overhead.
    - Never taller than the (sublane-rounded) input.
    """
    # Rough VMEM bytes per tile row: x (x2 buffers) + out (x2 buffers) +
    # y f32 temp, plus h f32 and its streaming-dtype cast.
    per_row = c_in * (2 * in_bytes + 2 * out_bytes + 4) + hidden_p * (4 + in_bytes)

    tm = max(int(max_tm), 8)
    while tm > 8 and tm * per_row > _VMEM_BUDGET:
        tm //= 2
    while tm > _MIN_PARALLEL_TM and pl.cdiv(n, tm) < 2:
        tm //= 2
    tm = min(tm, _round_up(max(n, 1), 8))
    return max(tm, 8)


# ----------------------------------------------------------------------------
# Wrapper.
# ----------------------------------------------------------------------------
def adapter_forward(x, w1, w2, *, stream_dtype=jnp.bfloat16, out_dtype=None,
                    max_tm=8192):
    """Adapter forward: ReLU(ReLU(x @ w1.T) @ w2.T).

    x:  (..., c_in)
    w1: (hidden, c_in)   first  nn.Linear (bias=False) weight
    w2: (c_in, hidden)   second nn.Linear (bias=False) weight

    stream_dtype: dtype used to stream x / weights through HBM (f32 MXU
        accumulation either way). None -> use x.dtype (bit-exact path).
    out_dtype: output dtype (None -> x.dtype).
    """
    orig_shape = x.shape
    c_in = orig_shape[-1]
    hidden = w1.shape[0]
    out_dtype = x.dtype if out_dtype is None else jnp.dtype(out_dtype)
    stream_dtype = x.dtype if stream_dtype is None else jnp.dtype(stream_dtype)

    x2d = x.reshape(-1, c_in)
    n = x2d.shape[0]

    # Lane-dense intermediate: pad only the (tiny) weights along hidden.
    hidden_p = _round_up(hidden, 128)

    # Streaming casts.  Weights are tiny; the x cast is the only extra HBM
    # pass and fuses with the producer in a real model (or skip it with
    # stream_dtype=None).
    xs = x2d.astype(stream_dtype)
    w1t = jnp.pad(w1.T, ((0, 0), (0, hidden_p - hidden))).astype(stream_dtype)
    w2t = jnp.pad(w2.T, ((0, hidden_p - hidden), (0, 0))).astype(stream_dtype)

    in_bytes = jnp.dtype(stream_dtype).itemsize
    out_bytes = jnp.dtype(out_dtype).itemsize
    tm = _choose_tm(n, c_in, hidden_p, in_bytes, out_bytes, max_tm)
    grid = (pl.cdiv(n, tm),)   # ragged tail block handled by Pallas masking

    out = pl.pallas_call(
        adapter_kernel,
        out_shape=jax.ShapeDtypeStruct((n, c_in), out_dtype),
        grid_spec=pltpu.PrefetchScalarGridSpec(
            num_scalar_prefetch=0,
            grid=grid,
            in_specs=[
                # x row tile marches down the row axis (last dim = full c_in).
                pl.BlockSpec((tm, c_in), lambda i: (i, 0)),
                # Constant block index => weights DMA'd once, VMEM-resident.
                pl.BlockSpec((c_in, hidden_p), lambda i: (0, 0)),
                pl.BlockSpec((hidden_p, c_in), lambda i: (0, 0)),
            ],
            out_specs=pl.BlockSpec((tm, c_in), lambda i: (i, 0)),
        ),
        compiler_params=pltpu.CompilerParams(
            dimension_semantics=("parallel",),
            vmem_limit_bytes=_VMEM_LIMIT),
    )(xs, w1t, w2t)

    return out.reshape(orig_shape)


def adapter_reference(x, w1, w2):
    h = jnp.maximum(x @ w1.T, 0.0)
    return jnp.maximum(h @ w2.T, 0.0)


if __name__ == "__main__":
    key = jax.random.PRNGKey(0)
    c_in = 128
    reduction = 4
    hidden = c_in // reduction  # 32
    batch = 8

    kx, kw1, kw2, kx2, kx3 = jax.random.split(key, 5)
    x = jax.random.normal(kx, (batch, c_in), dtype=jnp.float32)
    # Deterministic "kaiming-ish" init for the two bias-free Linear layers.
    w1 = jax.random.normal(kw1, (hidden, c_in), dtype=jnp.float32) * (1.0 / c_in) ** 0.5
    w2 = jax.random.normal(kw2, (c_in, hidden), dtype=jnp.float32) * (1.0 / hidden) ** 0.5

    y_ref = adapter_reference(x, w1, w2)

    # 1) Default path: bf16 streaming, f32 accumulation / f32 output.
    y = adapter_forward(x, w1, w2)
    jax.block_until_ready(y)
    assert y.shape == x.shape and y.dtype == x.dtype
    assert jnp.allclose(y, y_ref, atol=1e-1, rtol=1e-1), "bf16 streaming path mismatch"

    # 2) Bit-exact f32 streaming path.
    y32 = adapter_forward(x, w1, w2, stream_dtype=None)
    jax.block_until_ready(y32)
    assert jnp.allclose(y32, y_ref, atol=1e-5, rtol=1e-5)

    # 3) Leading batch dims + row count not a multiple of 8 (single ragged block).
    x2 = jax.random.normal(kx2, (3, 5, c_in), dtype=jnp.float32)
    y2 = adapter_forward(x2, w1, w2, stream_dtype=None)
    jax.block_until_ready(y2)
    assert y2.shape == x2.shape
    assert jnp.allclose(y2, adapter_reference(x2, w1, w2), atol=1e-5, rtol=1e-5)

    # 4) Multi-step grid with a ragged tail block (n=200, tile=64).
    x3 = jax.random.normal(kx3, (200, c_in), dtype=jnp.float32)
    y3 = adapter_forward(x3, w1, w2, stream_dtype=None, max_tm=64)
    jax.block_until_ready(y3)
    assert jnp.allclose(y3, adapter_reference(x3, w1, w2), atol=1e-5, rtol=1e-5)

    print("KERNEL_OK")
</pallas_src>

<mosaic_0001>
module attributes {stable_mosaic.version = 11 : i64} {
  func.func @adapter_kernel(%arg0: i32, %arg1: memref<8x128xbf16, #tpu.memory_space<vmem>>, %arg2: memref<128x128xbf16, #tpu.memory_space<vmem>>, %arg3: memref<128x128xbf16, #tpu.memory_space<vmem>>, %arg4: memref<8x128xf32, #tpu.memory_space<vmem>>) attributes {dimension_semantics = [#tpu.dimension_semantics<parallel>], iteration_bounds = array<i64: 1>, scalar_prefetch = 0 : i64, scratch_operands = 0 : i64, tpu.core_type = #tpu.core_type<tc>, window_params = [{transform_indices = @transform_0, window_bounds = array<i64: 8, 128>}, {pipeline_mode = #tpu.pipeline_mode<synchronous>, transform_indices = @transform_1, window_bounds = array<i64: 128, 128>}, {pipeline_mode = #tpu.pipeline_mode<synchronous>, transform_indices = @transform_2, window_bounds = array<i64: 128, 128>}, {transform_indices = @transform_3, window_bounds = array<i64: 8, 128>}]} {
    %c0 = arith.constant 0 : index
    %c0_0 = arith.constant 0 : index
    %0 = vector.load %arg1[%c0, %c0_0] : memref<8x128xbf16, #tpu.memory_space<vmem>>, vector<8x128xbf16>
    %c0_1 = arith.constant 0 : index
    %c0_2 = arith.constant 0 : index
    %1 = vector.load %arg2[%c0_1, %c0_2] : memref<128x128xbf16, #tpu.memory_space<vmem>>, vector<128x128xbf16>
    %cst = arith.constant dense<0.000000e+00> : vector<8x128xf32>
    %2 = tpu.matmul %0, %1, %cst {dimension_numbers = #tpu.dot_dimension_numbers<[1], [0], [0], [1], [0, 0, 1, 1], [], []>} : vector<8x128xbf16>, vector<128x128xbf16>, vector<8x128xf32> -> vector<8x128xf32>
    %cst_3 = arith.constant 0.000000e+00 : f32
    %3 = vector.broadcast %cst_3 : f32 to vector<8x128xf32>
    %4 = arith.maximumf %2, %3 : vector<8x128xf32>
    %5 = arith.truncf %4 : vector<8x128xf32> to vector<8x128xbf16>
    %c0_4 = arith.constant 0 : index
    %c0_5 = arith.constant 0 : index
    %6 = vector.load %arg3[%c0_4, %c0_5] : memref<128x128xbf16, #tpu.memory_space<vmem>>, vector<128x128xbf16>
    %cst_6 = arith.constant dense<0.000000e+00> : vector<8x128xf32>
    %7 = tpu.matmul %5, %6, %cst_6 {dimension_numbers = #tpu.dot_dimension_numbers<[1], [0], [0], [1], [0, 0, 1, 1], [], []>} : vector<8x128xbf16>, vector<128x128xbf16>, vector<8x128xf32> -> vector<8x128xf32>
    %cst_7 = arith.constant 0.000000e+00 : f32
    %8 = vector.broadcast %cst_7 : f32 to vector<8x128xf32>
    %9 = arith.maximumf %7, %8 : vector<8x128xf32>
    %c0_8 = arith.constant 0 : index
    %c0_9 = arith.constant 0 : index
    %10 = vector.load %arg4[%c0_8, %c0_9] : memref<8x128xf32, #tpu.memory_space<vmem>>, vector<8x128xf32>
    tpu.vector_store %arg4[%c0_8, %c0_9], %9 {strides = array<i32>} : memref<8x128xf32, #tpu.memory_space<vmem>>, vector<8x128xf32>,
    return
  }
  func.func @transform_0(%arg0: i32) -> (i32, i32) {
    %c0_i32 = arith.constant 0 : i32
    %c0_i32_0 = arith.constant 0 : i32
    return %arg0, %c0_i32 : i32, i32
  }
  func.func @transform_1(%arg0: i32) -> (i32, i32) {
    %c0_i32 = arith.constant 0 : i32
    %c0_i32_0 = arith.constant 0 : i32
    %c0_i32_1 = arith.constant 0 : i32
    return %c0_i32, %c0_i32_0 : i32, i32
  }
  func.func @transform_2(%arg0: i32) -> (i32, i32) {
    %c0_i32 = arith.constant 0 : i32
    %c0_i32_0 = arith.constant 0 : i32
    %c0_i32_1 = arith.constant 0 : i32
    return %c0_i32, %c0_i32_0 : i32, i32
  }
  func.func @transform_3(%arg0: i32) -> (i32, i32) {
    %c0_i32 = arith.constant 0 : i32
    %c0_i32_0 = arith.constant 0 : i32
    return %arg0, %c0_i32 : i32, i32
  }
}

</mosaic_0001>

<bundles_post_ra>
// kernel: tpu_custom_call.1
= control target key start
LH: loop header
LB: loop body
LE: loop exit
PB: predicated region body
PF: predicated region fallthrough
CT: control target
= control target key end

     0   :  { %8 = vsyncpa [#allocation3], 0  ;;  %s558_s0 = inlined_call_operand.hbm [shape: bf16[8,128], index: 0, kind: input, shape index: {}]   ;;  %s559_s1 = inlined_call_operand.hbm [shape: bf16[128,128], index: 1, kind: input, shape index: {}]   ;;  %s560_s2 = inlined_call_operand.hbm [shape: bf16[128,128], index: 2, kind: input, shape index: {}]   ;;  %s561_s3 = inlined_call_operand.hbm [shape: f32[8,128], index: 3, kind: output, shape index: {}]  }
   0x1   :  { %9 = vsyncpa [#allocation6], 0 }
   0x2   :  { %10 = vsyncpa [#allocation4], 0  ;;  %s476_s12 = smov [#allocation5]   ;;  %s382_s16 = scalar_lea.hbm %s559_s1, 1024 }
   0x3   :  { %s26_s13 = sshll.u32 %s476_s12, 4  ;;  %p383_p0 = scmp.ne.s32.totalorder %s559_s1, %s382_s16  ;;  %s27_s13 = int_to_ptr.vmem [resolvable:$true] %s26_s13 }
   0x4   :  { %p386_p1 = scmp.lt.u32.totalorder %s382_s16, %s559_s1 }
   0x6   :  { %p388_p2 = pnand %p386_p1, %p383_p0 }
   0x8   :  { %391 = shalt.err (!%p388_p2)
}
   0x9   :  { %s392_s21 = scalar_lea.vmem %s27_s13, 1024  ;;  %p397_p4 = scmp.lt.s32.totalorder %s27_s13, %s27_s13 }
   0xa   :  { %p393_p3 = scmp.ne.s32.totalorder %s27_s13, %s392_s21  ;;  %p398_p5 = scmp.lt.s32.totalorder %s392_s21, %s392_s21 }
   0xc   :  { %p399_p6 = por %p398_p5, %p397_p4 }
   0xe   :  { %p400_p7 = pnand %p399_p6, %p393_p3 }
  0x10   :  { %403 = shalt.err (!%p400_p7)
}
  0x11   :  { %s477_s22 = smov 64   ;;  %s478_s23 = smov 4  }
  0x12   :  { %32 = dma.hbm_to_vmem [thread:$0]  %s559_s1, 1024, %s27_s13, [#allocation6], %s477_s22, %s477_s22, %s478_s23  }
  0x13   :  { %s479_s26 = smov [#allocation2]   ;;  %s480_s28 = smov [#allocation7]  }
  0x14   :  { %s17_s27 = sshll.u32 %s479_s26, 4  ;;  %s38_s29 = sshll.u32 %s480_s28, 4  ;;  %s18_s27 = int_to_ptr.vmem [resolvable:$true] %s17_s27  ;;  %s39_s29 = int_to_ptr.vmem [resolvable:$true] %s38_s29 }
  0x15   :  { %s404_s5 = scalar_lea.hbm %s558_s0, 64 }
  0x16   :  { %p405_p8 = scmp.ne.s32.totalorder %s558_s0, %s404_s5  ;;  %p408_p9 = scmp.lt.u32.totalorder %s404_s5, %s558_s0 }
  0x18   :  { %p410_p10 = pnand %p408_p9, %p405_p8 }
  0x1a   :  { %413 = shalt.err (!%p410_p10)
}
  0x1b   :  { %s414_s1 = scalar_lea.vmem %s18_s27, 64  ;;  %p419_p12 = scmp.lt.s32.totalorder %s18_s27, %s18_s27 }
  0x1c   :  { %p415_p11 = scmp.ne.s32.totalorder %s18_s27, %s414_s1  ;;  %p420_p13 = scmp.lt.s32.totalorder %s414_s1, %s414_s1 }
  0x1e   :  { %p421_p0 = por %p420_p13, %p419_p12 }
  0x20   :  { %p422_p1 = pnand %p421_p0, %p415_p11 }
  0x22   :  { %425 = shalt.err (!%p422_p1)
}
  0x23   :  { %20 = dma.hbm_to_vmem [thread:$0]  %s558_s0, 64, %s18_s27, [#allocation3]  }
  0x24   :  { %s426_s14 = scalar_lea.hbm %s560_s2, 1024 }
  0x25   :  { %p427_p2 = scmp.ne.s32.totalorder %s560_s2, %s426_s14  ;;  %p430_p3 = scmp.lt.u32.totalorder %s426_s14, %s560_s2 }
  0x27   :  { %p432_p4 = pnand %p430_p3, %p427_p2 }
  0x29   :  { %435 = shalt.err (!%p432_p4)
}
  0x2a   :  { %s436_s19 = scalar_lea.vmem %s39_s29, 1024  ;;  %p441_p6 = scmp.lt.s32.totalorder %s39_s29, %s39_s29 }
  0x2b   :  { %p437_p5 = scmp.ne.s32.totalorder %s39_s29, %s436_s19  ;;  %p442_p7 = scmp.lt.s32.totalorder %s436_s19, %s436_s19 }
  0x2d   :  { %p443_p8 = por %p442_p7, %p441_p6 }
  0x2f   :  { %p444_p9 = pnand %p443_p8, %p437_p5 }
  0x31   :  { %447 = shalt.err (!%p444_p9)
}
  0x32   :  { %44 = dma.hbm_to_vmem [thread:$0]  %s560_s2, 1024, %s39_s29, [#allocation6], %s477_s22, %s477_s22, %s478_s23  }
  0x33   :  { %470 = dma.done.wait [#allocation3], 64  }
  0x34   :  { %471 = vsyncadd [#allocation3], 4294967232 }
  0x35   :  { %472 = dma.done.wait [#allocation6], 2048  }
  0x36   :  { %473 = vsyncadd [#allocation6], 4294965248  ;;  %v481_v0 = vmov 0.0   ;;  %vm482_vm0 = vmmov 0   ;;  %v366_v1 = vld [vmem:[#allocation5] sm:$0xff]   ;;  %v367_v2 = vld [vmem:[#allocation5 + $0x8] sm:$0xff]  }
  0x37   :  { %318 = vmatprep.subr.bf16.mxu0 %v481_v0  ;;  %334 = vmatprep.mubr.msk.bf16.mxu0 %vm482_vm0, %v481_v0  ;;  %v368_v3 = vld [vmem:[#allocation5 + $0x10] sm:$0xff]   ;;  %v374_v4 = vld [vmem:[#allocation7] sm:$0xff]   ;;  %v369_v5 = vld [vmem:[#allocation5 + $0x18] sm:$0xff]   ;;  %s483_s2 = smov [#allocation8]  }
  0x38   :  { %338 = vmatprep.subr.bf16.mxu1 %v481_v0  ;;  %354 = vmatprep.mubr.msk.bf16.mxu1 %vm482_vm0, %v481_v0  ;;  %v375_v6 = vld [vmem:[#allocation7 + $0x8] sm:$0xff]   ;;  %v370_v7 = vld [vmem:[#allocation5 + $0x20] sm:$0xff]   ;;  %v376_v8 = vld [vmem:[#allocation7 + $0x10] sm:$0xff]   ;;  %s274_s21 = sshll.u32 %s483_s2, 4  ;;  %s275_s21 = int_to_ptr.vmem [resolvable:$true] %s274_s21 }
  0x39   :  { %319 = vmatpush3.bf16.msra.mxu0 %v366_v1  ;;  %339 = vmatpush3.bf16.msra.mxu1 %v374_v4  ;;  %v371_v9 = vld [vmem:[#allocation5 + $0x28] sm:$0xff]   ;;  %v377_v10 = vld [vmem:[#allocation7 + $0x18] sm:$0xff]   ;;  %v372_v11 = vld [vmem:[#allocation5 + $0x30] sm:$0xff]   ;;  %s448_s22 = scalar_lea.vmem %s275_s21, 128  ;;  %p453_p11 = scmp.lt.s32.totalorder %s275_s21, %s275_s21 }
  0x3a   :  { %320 = vmatprep.subr.bf16.mxu0 %v481_v0  ;;  %340 = vmatprep.subr.bf16.mxu1 %v481_v0  ;;  %v378_v12 = vld [vmem:[#allocation7 + $0x20] sm:$0xff]   ;;  %v373_v13 = vld [vmem:[#allocation5 + $0x38] sm:$0xff]   ;;  %v379_v14 = vld [vmem:[#allocation7 + $0x28] sm:$0xff]   ;;  %p449_p10 = scmp.ne.s32.totalorder %s275_s21, %s448_s22  ;;  %p454_p12 = scmp.lt.s32.totalorder %s448_s22, %s448_s22 }
  0x3b   :  { %v55_v15 = vld [vmem:[#allocation2] sm:$0xf]  ;;  %v380_v16 = vld [vmem:[#allocation7 + $0x30] sm:$0xff]  }
  0x3c   :  { %v381_v17 = vld [vmem:[#allocation7 + $0x38] sm:$0xff]   ;;  %p455_p13 = por %p454_p12, %p453_p11 }
  0x3d   :  { %321 = vmatpush3.bf16.msra.mxu0 %v367_v2  ;;  %341 = vmatpush3.bf16.msra.mxu1 %v375_v6 }
  0x3e   :  { %322 = vmatprep.subr.bf16.mxu0 %v481_v0  ;;  %342 = vmatprep.subr.bf16.mxu1 %v481_v0  ;;  %p456_p0 = pnand %p455_p13, %p449_p10 }
  0x41   :  { %323 = vmatpush3.bf16.msra.mxu0 %v368_v3  ;;  %343 = vmatpush3.bf16.msra.mxu1 %v376_v8 }
  0x42   :  { %324 = vmatprep.subr.bf16.mxu0 %v481_v0  ;;  %344 = vmatprep.subr.bf16.mxu1 %v481_v0 }
  0x45   :  { %325 = vmatpush3.bf16.msra.mxu0 %v369_v5  ;;  %345 = vmatpush3.bf16.msra.mxu1 %v377_v10 }
  0x46   :  { %326 = vmatprep.subr.bf16.mxu0 %v481_v0  ;;  %346 = vmatprep.subr.bf16.mxu1 %v481_v0 }
  0x49   :  { %327 = vmatpush3.bf16.msra.mxu0 %v370_v7  ;;  %347 = vmatpush3.bf16.msra.mxu1 %v378_v12 }
  0x4a   :  { %328 = vmatprep.subr.bf16.mxu0 %v481_v0  ;;  %348 = vmatprep.subr.bf16.mxu1 %v481_v0 }
  0x4d   :  { %329 = vmatpush3.bf16.msra.mxu0 %v371_v9  ;;  %349 = vmatpush3.bf16.msra.mxu1 %v379_v14 }
  0x4e   :  { %330 = vmatprep.subr.bf16.mxu0 %v481_v0  ;;  %350 = vmatprep.subr.bf16.mxu1 %v481_v0 }
  0x51   :  { %331 = vmatpush3.bf16.msra.mxu0 %v372_v11  ;;  %351 = vmatpush3.bf16.msra.mxu1 %v380_v16 }
  0x52   :  { %332 = vmatprep.subr.bf16.mxu0 %v481_v0  ;;  %352 = vmatprep.subr.bf16.mxu1 %v481_v0 }
  0x55   :  { %333 = vmatpush3.bf16.msra.mxu0 %v373_v13  ;;  %353 = vmatpush3.bf16.msra.mxu1 %v381_v17 }
  0x58   :  { %335 = vmatmul.mubr.bf16.vlgmr.msra.gmra.mrb[0].mxu0 %v55_v15 }
 0x12b   :  { %v154_v18 = vpop.f32.mrb[0].mxu0 }
 0x12c   :  { %v160_v19 = vmax.f32 %v154_v18, 0.0  ;;  %v336_v20 = vpop.f32.mrb[1].mxu0 }
 0x12d   :  { %v157_v21 = vpop.f32.mrb[2].mxu0 }
 0x12e   :  { %v161_v22 = vpack.c.bf16 %v160_v19, %v160_v19  ;;  %v337_v23 = vpop.f32.mrb[3].mxu0 }
 0x130   :  { %355 = vmatmul.mubr.bf16.vlgmr.msra.gmra.mrb[0].mxu1 %v161_v22 }
 0x203   :  { %v260_v24 = vpop.f32.mrb[0].mxu1 }
 0x204   :  { %v266_v25 = vmax.f32 %v260_v24, 0.0  ;;  %v356_v26 = vpop.f32.mrb[1].mxu1 }
 0x205   :  { %v263_v27 = vpop.f32.mrb[2].mxu1 }
 0x206   :  { %267 = vst [vmem:[#allocation8] sm:$0xff] %v266_v25  ;;  %v357_v28 = vpop.f32.mrb[3].mxu1 }
 0x207   :  { %459 = shalt.err (!%p456_p0)
}
 0x208   :  { %s460_s25 = scalar_lea.hbm %s561_s3, 128 }
 0x209   :  { %p461_p1 = scmp.ne.s32.totalorder %s561_s3, %s460_s25  ;;  %p464_p2 = scmp.lt.u32.totalorder %s460_s25, %s561_s3 }
 0x20b   :  { %p466_p3 = pnand %p464_p2, %p461_p1 }
 0x20d   :  { %469 = shalt.err (!%p466_p3)
}
 0x20e   :  { %277 = dma.vmem_to_hbm [thread:$0]  %s275_s21, 128, %s561_s3, [#allocation4]  }
 0x20f   :  { %474 = dma.done.wait [#allocation4], 128  }
 0x210   :  { %475 = vsyncadd [#allocation4], 4294967168 }
 0x211   :  { %281 = vsyncpa [#allocation3], 1 }
 0x212   :  { %282 = vsyncpa [#allocation6], 1 }
 0x213   :  { %283 = vsyncpa [#allocation4], 1 }

</bundles_post_ra>
